<compile_context>
chip_gen: v7x
topology: tpu7x:2x2x1
jax: 0.10.0
libtpu: 0.0.40
codegen_flags: <defaults>
</compile_context>

<pallas_src>
import functools

import jax
import jax.numpy as jnp
from jax.experimental import pallas as pl
from jax.experimental.pallas import tpu as pltpu

_EPS = 1e-5


def _fused_encoder_kernel(x_ref, sup_ref, sdn_ref,
                          w1b_ref, p1_ref, g1_ref, be1_ref,
                          w2b_ref, p2_ref, g2_ref, be2_ref,
                          out_ref, *, n, h, w, cin, c1):
    """Fused conv1+BN1+ReLU -> conv2+BN2+Tanh (lane layout: (w, c) in lanes).

    x_ref  : (N*H, W*Cin)     input slab (no duplication, no H padding)
    sup/sdn: (N*H, N*H)       constant per-image row-shift matrices (0/1)
    w1b    : (3*W*Cin, W*C1)  banded conv1 weights (dy-major row blocks)
    p1     : (W*C1, W*C1)     J_W (x) I_C1  channel pool/broadcast matrix
    g1/be1 : (1, W*C1)        BN1 gamma / beta tiled over w
    w2b    : (3*W*C1, W*Cout) banded conv2 weights
    p2     : (W*Cout, W*Cout)
    g2/be2 : (1, W*Cout)
    out_ref: (N*H, W*Cout)    lane-dense output
    """
    inv_m = 1.0 / float(n * h * w)        # 1 / samples-per-channel (batch stats)
    wcin = w * cin
    wc1 = w * c1

    x = x_ref[...]                        # (NH, W*Cin)
    s_up = sup_ref[...]                   # (NH, NH): row r <- row r-1 (0 at image top)
    s_dn = sdn_ref[...]                   # (NH, NH): row r <- row r+1 (0 at image bottom)

    def band_conv(act, wb_ref, kwc):
        """3x3 'SAME' conv = 3 accumulated banded MXU dots (one per dy tap).

        W-direction zero padding is baked into the zeros of the band; the
        H-direction taps are produced in-register by the constant shift
        matmuls (no scratch, no halo store/reload).
        """
        acc = jnp.dot(act, wb_ref[kwc:2 * kwc, :],               # dy = 1 (center)
                      preferred_element_type=jnp.float32)
        up = jnp.dot(s_up, act, preferred_element_type=jnp.float32)
        acc = acc + jnp.dot(up, wb_ref[0:kwc, :],                # dy = 0 (row above)
                            preferred_element_type=jnp.float32)
        dn = jnp.dot(s_dn, act, preferred_element_type=jnp.float32)
        acc = acc + jnp.dot(dn, wb_ref[2 * kwc:3 * kwc, :],      # dy = 2 (row below)
                            preferred_element_type=jnp.float32)
        return acc

    def batch_norm(acts, p_ref, g_ref, be_ref):
        """Training-mode BN folded into a single per-lane scale+shift.

        Row-sum and row-sumsq are stacked into one (2, W*C) operand and pooled
        per channel (sum over w-groups, broadcast back) with ONE matmul.
        One-pass variance (E[x^2]-E[x]^2) is fine at this scale; conv bias was
        dropped so activations stay centered enough for f32.
        """
        wc = acts.shape[-1]
        s_row = jnp.sum(acts, axis=0, keepdims=True)             # (1, WC)
        q_row = jnp.sum(acts * acts, axis=0, keepdims=True)      # (1, WC)
        rid = jax.lax.broadcasted_iota(jnp.int32, (2, wc), 0)
        stat = jnp.where(rid == 0, s_row, q_row)                 # (2, WC)
        pooled = jnp.dot(stat, p_ref[...], preferred_element_type=jnp.float32)
        mean = pooled[0:1, :] * inv_m
        var = jnp.maximum(pooled[1:2, :] * inv_m - mean * mean, 0.0)
        scale = g_ref[...] * jax.lax.rsqrt(var + _EPS)
        shift = be_ref[...] - mean * scale
        return acts * scale + shift

    # ---- stage 1: conv1 + BN1 + ReLU ----
    h1 = band_conv(x, w1b_ref, wcin)
    y1 = jnp.maximum(batch_norm(h1, p1_ref, g1_ref, be1_ref), 0.0)   # (NH, W*C1)

    # ---- stage 2: conv2 + BN2 + Tanh, lane-dense store ----
    h2 = band_conv(y1, w2b_ref, wc1)
    out_ref[...] = jnp.tanh(batch_norm(h2, p2_ref, g2_ref, be2_ref))


def _banded_conv_weight(w_hwio, width):
    """Fold 3x3 HWIO conv weights into a (3*W*Cin, W*Cout) block-banded matrix.

    Row index = dy*W*Cin + wi*Cin + ci, col index = wo*Cout + co.
    The zero entries of the band implement the W-direction 'SAME' zero padding.
    """
    kh, kw, cin, cout = w_hwio.shape
    wi = jnp.arange(width)[None, :, None]
    wo = jnp.arange(width)[None, None, :]
    dx = jnp.arange(kw)[:, None, None]
    band = (wi == wo + dx - 1).astype(w_hwio.dtype)            # (KW, W, W)
    big = jnp.einsum("xio,yxcd->yicod", band, w_hwio)          # (KH, W, Cin, W, Cout)
    return big.reshape(kh * width * cin, width * cout)


def _channel_pool_matrix(c, width):
    """(W*C, W*C) = J_W (x) I_C : sum per channel over w, broadcast back over w."""
    return jnp.tile(jnp.eye(c, dtype=jnp.float32), (width, width))


def _row_shift_matrices(n, h):
    """Constant (N*H, N*H) 0/1 matrices selecting the row above / below within
    each image (zero across image boundaries = the H-direction 'SAME' pad)."""
    nh = n * h
    r = jnp.arange(nh)
    r_out = r[:, None]
    r_src = r[None, :]
    same_img = (r_out // h) == (r_src // h)
    s_up = jnp.where((r_src == r_out - 1) & same_img, 1.0, 0.0).astype(jnp.float32)
    s_dn = jnp.where((r_src == r_out + 1) & same_img, 1.0, 0.0).astype(jnp.float32)
    return s_up, s_dn


def prepare_constants(params, width):
    """Fold conv weights / BN affine params into kernel operands.

    Call ONCE per parameter set (hoisted out of the per-call forward)."""
    w1, b1, g1, be1, w2, b2, g2, be2 = params
    del b1, b2   # conv bias is exactly cancelled by the BN mean subtraction
    c1 = w1.shape[-1]
    cout = w2.shape[-1]
    w1b = _banded_conv_weight(w1.astype(jnp.float32), width)   # (3*W*Cin, W*C1)
    w2b = _banded_conv_weight(w2.astype(jnp.float32), width)   # (3*W*C1, W*Cout)
    p1 = _channel_pool_matrix(c1, width)
    p2 = _channel_pool_matrix(cout, width)
    g1l = jnp.tile(g1, width).reshape(1, width * c1).astype(jnp.float32)
    be1l = jnp.tile(be1, width).reshape(1, width * c1).astype(jnp.float32)
    g2l = jnp.tile(g2, width).reshape(1, width * cout).astype(jnp.float32)
    be2l = jnp.tile(be2, width).reshape(1, width * cout).astype(jnp.float32)
    return (w1b, p1, g1l, be1l, w2b, p2, g2l, be2l)


@jax.jit
def encoder_client_forward(x_nchw, consts):
    """Forward pass matching Encoder_Client.forward. x_nchw: (N, Cin, H, W)."""
    w1b, p1, g1l, be1l, w2b, p2, g2l, be2l = consts
    n, cin, h, w = x_nchw.shape
    c1 = g1l.shape[-1] // w
    cout = g2l.shape[-1] // w

    # NCHW -> NHWC -> collapse (W, C) into the lane dim; no padding, no 3x dup.
    x2d = jnp.transpose(x_nchw, (0, 2, 3, 1)).astype(jnp.float32) \
             .reshape(n * h, w * cin)                              # (N*H, W*Cin)
    s_up, s_dn = _row_shift_matrices(n, h)                         # tiny constants

    vmem = pl.BlockSpec(memory_space=pltpu.MemorySpace.VMEM)
    kernel = functools.partial(_fused_encoder_kernel, n=n, h=h, w=w, cin=cin, c1=c1)
    out2d = pl.pallas_call(
        kernel,
        out_shape=jax.ShapeDtypeStruct((n * h, w * cout), jnp.float32),
        in_specs=[vmem] * 11,
        out_specs=vmem,
    )(x2d, s_up, s_dn, w1b, p1, g1l, be1l, w2b, p2, g2l, be2l)

    # (N*H, W*Cout) -> NHWC -> NCHW
    y = out2d.reshape(n, h, w, cout)
    return jnp.transpose(y, (0, 3, 1, 2))


def reference_forward(x_nchw, params):
    """Pure-JAX reference (same math, no Pallas) for a correctness check."""
    w1, b1, g1, be1, w2, b2, g2, be2 = params
    x = jnp.transpose(x_nchw, (0, 2, 3, 1)).astype(jnp.float32)

    def conv(x, w, b):
        y = jax.lax.conv_general_dilated(
            x, w, window_strides=(1, 1), padding="SAME",
            dimension_numbers=("NHWC", "HWIO", "NHWC"))
        return y + b.reshape(1, 1, 1, -1)

    def bn(y, g, be):
        m = jnp.mean(y, axis=(0, 1, 2), keepdims=True)
        v = jnp.mean((y - m) ** 2, axis=(0, 1, 2), keepdims=True)
        return (y - m) * jax.lax.rsqrt(v + _EPS) * g.reshape(1, 1, 1, -1) \
            + be.reshape(1, 1, 1, -1)

    y = jnp.maximum(bn(conv(x, w1, b1), g1, be1), 0.0)
    y = jnp.tanh(bn(conv(y, w2, b2), g2, be2))
    return jnp.transpose(y, (0, 3, 1, 2))


def init_params(key, in_ch, out_ch):
    ks = jax.random.split(key, 8)
    # conv weights stored HWIO: (3, 3, Cin, Cout)
    w1 = jax.random.normal(ks[0], (3, 3, in_ch, in_ch), jnp.float32) * 0.1
    b1 = jax.random.normal(ks[1], (in_ch,), jnp.float32) * 0.1
    g1 = 1.0 + jax.random.normal(ks[2], (in_ch,), jnp.float32) * 0.05
    be1 = jax.random.normal(ks[3], (in_ch,), jnp.float32) * 0.05
    w2 = jax.random.normal(ks[4], (3, 3, in_ch, out_ch), jnp.float32) * 0.1
    b2 = jax.random.normal(ks[5], (out_ch,), jnp.float32) * 0.1
    g2 = 1.0 + jax.random.normal(ks[6], (out_ch,), jnp.float32) * 0.05
    be2 = jax.random.normal(ks[7], (out_ch,), jnp.float32) * 0.05
    return (w1, b1, g1, be1, w2, b2, g2, be2)


if __name__ == "__main__":
    key = jax.random.PRNGKey(0)
    k_x, k_p = jax.random.split(key)

    N, in_ch, out_ch, H, W = 2, 4, 8, 16, 16
    x = jax.random.normal(k_x, (N, in_ch, H, W), jnp.float32)   # NCHW, like PyTorch
    params = init_params(k_p, in_ch, out_ch)

    consts = prepare_constants(params, W)   # hoisted: once per parameter set
    out = jax.block_until_ready(encoder_client_forward(x, consts))
    assert out.shape == (N, out_ch, H, W), out.shape

    ref = jax.block_until_ready(reference_forward(x, params))
    assert jnp.allclose(out, ref, atol=2e-3, rtol=2e-3), \
        float(jnp.max(jnp.abs(out - ref)))

    print("KERNEL_OK")
</pallas_src>

<mosaic_0001>
module attributes {stable_mosaic.version = 11 : i64} {
  func.func @_fused_encoder_kernel(%arg0: memref<32x64xf32, #tpu.memory_space<vmem>>, %arg1: memref<32x32xf32, #tpu.memory_space<vmem>>, %arg2: memref<32x32xf32, #tpu.memory_space<vmem>>, %arg3: memref<192x64xf32, #tpu.memory_space<vmem>>, %arg4: memref<64x64xf32, #tpu.memory_space<vmem>>, %arg5: memref<1x64xf32, #tpu.memory_space<vmem>>, %arg6: memref<1x64xf32, #tpu.memory_space<vmem>>, %arg7: memref<192x128xf32, #tpu.memory_space<vmem>>, %arg8: memref<128x128xf32, #tpu.memory_space<vmem>>, %arg9: memref<1x128xf32, #tpu.memory_space<vmem>>, %arg10: memref<1x128xf32, #tpu.memory_space<vmem>>, %arg11: memref<32x128xf32, #tpu.memory_space<vmem>>) attributes {dimension_semantics = [], scalar_prefetch = 0 : i64, scratch_operands = 0 : i64, tpu.core_type = #tpu.core_type<tc>} {
    %c0 = arith.constant 0 : index
    %c0_0 = arith.constant 0 : index
    %0 = vector.load %arg0[%c0, %c0_0] : memref<32x64xf32, #tpu.memory_space<vmem>>, vector<32x64xf32>
    %c0_1 = arith.constant 0 : index
    %c0_2 = arith.constant 0 : index
    %1 = vector.load %arg1[%c0_1, %c0_2] : memref<32x32xf32, #tpu.memory_space<vmem>>, vector<32x32xf32>
    %c0_3 = arith.constant 0 : index
    %c0_4 = arith.constant 0 : index
    %2 = vector.load %arg2[%c0_3, %c0_4] : memref<32x32xf32, #tpu.memory_space<vmem>>, vector<32x32xf32>
    %c64 = arith.constant 64 : index
    %c0_5 = arith.constant 0 : index
    %3 = vector.load %arg3[%c64, %c0_5] : memref<192x64xf32, #tpu.memory_space<vmem>>, vector<64x64xf32>
    %cst = arith.constant dense<0.000000e+00> : vector<32x64xf32>
    %4 = tpu.matmul %0, %3, %cst {dimension_numbers = #tpu.dot_dimension_numbers<[1], [0], [0], [1], [0, 0, 1, 1], [], []>} : vector<32x64xf32>, vector<64x64xf32>, vector<32x64xf32> -> vector<32x64xf32>
    %cst_6 = arith.constant dense<0.000000e+00> : vector<32x64xf32>
    %5 = tpu.matmul %1, %0, %cst_6 {dimension_numbers = #tpu.dot_dimension_numbers<[1], [0], [0], [1], [0, 0, 1, 1], [], []>} : vector<32x32xf32>, vector<32x64xf32>, vector<32x64xf32> -> vector<32x64xf32>
    %c0_7 = arith.constant 0 : index
    %c0_8 = arith.constant 0 : index
    %6 = vector.load %arg3[%c0_7, %c0_8] : memref<192x64xf32, #tpu.memory_space<vmem>>, vector<64x64xf32>
    %cst_9 = arith.constant dense<0.000000e+00> : vector<32x64xf32>
    %7 = tpu.matmul %5, %6, %cst_9 {dimension_numbers = #tpu.dot_dimension_numbers<[1], [0], [0], [1], [0, 0, 1, 1], [], []>} : vector<32x64xf32>, vector<64x64xf32>, vector<32x64xf32> -> vector<32x64xf32>
    %8 = arith.addf %4, %7 : vector<32x64xf32>
    %cst_10 = arith.constant dense<0.000000e+00> : vector<32x64xf32>
    %9 = tpu.matmul %2, %0, %cst_10 {dimension_numbers = #tpu.dot_dimension_numbers<[1], [0], [0], [1], [0, 0, 1, 1], [], []>} : vector<32x32xf32>, vector<32x64xf32>, vector<32x64xf32> -> vector<32x64xf32>
    %c128 = arith.constant 128 : index
    %c0_11 = arith.constant 0 : index
    %10 = vector.load %arg3[%c128, %c0_11] : memref<192x64xf32, #tpu.memory_space<vmem>>, vector<64x64xf32>
    %cst_12 = arith.constant dense<0.000000e+00> : vector<32x64xf32>
    %11 = tpu.matmul %9, %10, %cst_12 {dimension_numbers = #tpu.dot_dimension_numbers<[1], [0], [0], [1], [0, 0, 1, 1], [], []>} : vector<32x64xf32>, vector<64x64xf32>, vector<32x64xf32> -> vector<32x64xf32>
    %12 = arith.addf %8, %11 : vector<32x64xf32>
    %cst_13 = arith.constant dense<0.000000e+00> : vector<64xf32>
    %13 = vector.multi_reduction <add>, %12, %cst_13 [0] : vector<32x64xf32> to vector<64xf32>
    %14 = vector.shape_cast %13 : vector<64xf32> to vector<1x64xf32>
    %15 = arith.mulf %12, %12 : vector<32x64xf32>
    %cst_14 = arith.constant dense<0.000000e+00> : vector<64xf32>
    %16 = vector.multi_reduction <add>, %15, %cst_14 [0] : vector<32x64xf32> to vector<64xf32>
    %17 = vector.shape_cast %16 : vector<64xf32> to vector<1x64xf32>
    %18 = tpu.iota {dimensions = array<i32: 0>} : vector<2x64xi32>
    %c0_i32 = arith.constant 0 : i32
    %19 = vector.broadcast %c0_i32 : i32 to vector<2x64xi32>
    %20 = arith.cmpi eq, %18, %19 : vector<2x64xi32>
    %21 = vector.shape_cast %14 : vector<1x64xf32> to vector<1x64xf32>
    %22 = vector.broadcast %21 : vector<1x64xf32> to vector<2x64xf32>
    %23 = vector.shape_cast %17 : vector<1x64xf32> to vector<1x64xf32>
    %24 = vector.broadcast %23 : vector<1x64xf32> to vector<2x64xf32>
    %25 = arith.select %20, %22, %24 : vector<2x64xi1>, vector<2x64xf32>
    %c0_15 = arith.constant 0 : index
    %c0_16 = arith.constant 0 : index
    %26 = vector.load %arg4[%c0_15, %c0_16] : memref<64x64xf32, #tpu.memory_space<vmem>>, vector<64x64xf32>
    %cst_17 = arith.constant dense<0.000000e+00> : vector<2x64xf32>
    %27 = tpu.matmul %25, %26, %cst_17 {dimension_numbers = #tpu.dot_dimension_numbers<[1], [0], [0], [1], [0, 0, 1, 1], [], []>} : vector<2x64xf32>, vector<64x64xf32>, vector<2x64xf32> -> vector<2x64xf32>
    %28 = vector.extract_strided_slice %27 {offsets = [0, 0], sizes = [1, 64], strides = [1, 1]} : vector<2x64xf32> to vector<1x64xf32>
    %cst_18 = arith.constant 0.001953125 : f32
    %29 = vector.broadcast %cst_18 : f32 to vector<1x64xf32>
    %30 = arith.mulf %28, %29 : vector<1x64xf32>
    %31 = vector.extract_strided_slice %27 {offsets = [1, 0], sizes = [1, 64], strides = [1, 1]} : vector<2x64xf32> to vector<1x64xf32>
    %cst_19 = arith.constant 0.001953125 : f32
    %32 = vector.broadcast %cst_19 : f32 to vector<1x64xf32>
    %33 = arith.mulf %31, %32 : vector<1x64xf32>
    %34 = arith.mulf %30, %30 : vector<1x64xf32>
    %35 = arith.subf %33, %34 : vector<1x64xf32>
    %cst_20 = arith.constant 0.000000e+00 : f32
    %36 = vector.broadcast %cst_20 : f32 to vector<1x64xf32>
    %37 = arith.maximumf %35, %36 : vector<1x64xf32>
    %c0_21 = arith.constant 0 : index
    %c0_22 = arith.constant 0 : index
    %38 = vector.load %arg5[%c0_21, %c0_22] : memref<1x64xf32, #tpu.memory_space<vmem>>, vector<1x64xf32>
    %cst_23 = arith.constant 9.99999974E-6 : f32
    %39 = vector.broadcast %cst_23 : f32 to vector<1x64xf32>
    %40 = arith.addf %37, %39 : vector<1x64xf32>
    %41 = math.rsqrt %40 : vector<1x64xf32>
    %42 = arith.mulf %38, %41 : vector<1x64xf32>
    %c0_24 = arith.constant 0 : index
    %c0_25 = arith.constant 0 : index
    %43 = vector.load %arg6[%c0_24, %c0_25] : memref<1x64xf32, #tpu.memory_space<vmem>>, vector<1x64xf32>
    %44 = arith.mulf %30, %42 : vector<1x64xf32>
    %45 = arith.subf %43, %44 : vector<1x64xf32>
    %46 = vector.broadcast %42 : vector<1x64xf32> to vector<32x64xf32>
    %47 = arith.mulf %12, %46 : vector<32x64xf32>
    %48 = vector.broadcast %45 : vector<1x64xf32> to vector<32x64xf32>
    %49 = arith.addf %47, %48 : vector<32x64xf32>
    %cst_26 = arith.constant 0.000000e+00 : f32
    %50 = vector.broadcast %cst_26 : f32 to vector<32x64xf32>
    %51 = arith.maximumf %49, %50 : vector<32x64xf32>
    %c64_27 = arith.constant 64 : index
    %c0_28 = arith.constant 0 : index
    %52 = vector.load %arg7[%c64_27, %c0_28] : memref<192x128xf32, #tpu.memory_space<vmem>>, vector<64x128xf32>
    %cst_29 = arith.constant dense<0.000000e+00> : vector<32x128xf32>
    %53 = tpu.matmul %51, %52, %cst_29 {dimension_numbers = #tpu.dot_dimension_numbers<[1], [0], [0], [1], [0, 0, 1, 1], [], []>} : vector<32x64xf32>, vector<64x128xf32>, vector<32x128xf32> -> vector<32x128xf32>
    %cst_30 = arith.constant dense<0.000000e+00> : vector<32x64xf32>
    %54 = tpu.matmul %1, %51, %cst_30 {dimension_numbers = #tpu.dot_dimension_numbers<[1], [0], [0], [1], [0, 0, 1, 1], [], []>} : vector<32x32xf32>, vector<32x64xf32>, vector<32x64xf32> -> vector<32x64xf32>
    %c0_31 = arith.constant 0 : index
    %c0_32 = arith.constant 0 : index
    %55 = vector.load %arg7[%c0_31, %c0_32] : memref<192x128xf32, #tpu.memory_space<vmem>>, vector<64x128xf32>
    %cst_33 = arith.constant dense<0.000000e+00> : vector<32x128xf32>
    %56 = tpu.matmul %54, %55, %cst_33 {dimension_numbers = #tpu.dot_dimension_numbers<[1], [0], [0], [1], [0, 0, 1, 1], [], []>} : vector<32x64xf32>, vector<64x128xf32>, vector<32x128xf32> -> vector<32x128xf32>
    %57 = arith.addf %53, %56 : vector<32x128xf32>
    %cst_34 = arith.constant dense<0.000000e+00> : vector<32x64xf32>
    %58 = tpu.matmul %2, %51, %cst_34 {dimension_numbers = #tpu.dot_dimension_numbers<[1], [0], [0], [1], [0, 0, 1, 1], [], []>} : vector<32x32xf32>, vector<32x64xf32>, vector<32x64xf32> -> vector<32x64xf32>
    %c128_35 = arith.constant 128 : index
    %c0_36 = arith.constant 0 : index
    %59 = vector.load %arg7[%c128_35, %c0_36] : memref<192x128xf32, #tpu.memory_space<vmem>>, vector<64x128xf32>
    %cst_37 = arith.constant dense<0.000000e+00> : vector<32x128xf32>
    %60 = tpu.matmul %58, %59, %cst_37 {dimension_numbers = #tpu.dot_dimension_numbers<[1], [0], [0], [1], [0, 0, 1, 1], [], []>} : vector<32x64xf32>, vector<64x128xf32>, vector<32x128xf32> -> vector<32x128xf32>
    %61 = arith.addf %57, %60 : vector<32x128xf32>
    %cst_38 = arith.constant dense<0.000000e+00> : vector<128xf32>
    %62 = vector.multi_reduction <add>, %61, %cst_38 [0] : vector<32x128xf32> to vector<128xf32>
    %63 = vector.shape_cast %62 : vector<128xf32> to vector<1x128xf32>
    %64 = arith.mulf %61, %61 : vector<32x128xf32>
    %cst_39 = arith.constant dense<0.000000e+00> : vector<128xf32>
    %65 = vector.multi_reduction <add>, %64, %cst_39 [0] : vector<32x128xf32> to vector<128xf32>
    %66 = vector.shape_cast %65 : vector<128xf32> to vector<1x128xf32>
    %67 = tpu.iota {dimensions = array<i32: 0>} : vector<2x128xi32>
    %c0_i32_40 = arith.constant 0 : i32
    %68 = vector.broadcast %c0_i32_40 : i32 to vector<2x128xi32>
    %69 = arith.cmpi eq, %67, %68 : vector<2x128xi32>
    %70 = vector.shape_cast %63 : vector<1x128xf32> to vector<1x128xf32>
    %71 = vector.broadcast %70 : vector<1x128xf32> to vector<2x128xf32>
    %72 = vector.shape_cast %66 : vector<1x128xf32> to vector<1x128xf32>
    %73 = vector.broadcast %72 : vector<1x128xf32> to vector<2x128xf32>
    %74 = arith.select %69, %71, %73 : vector<2x128xi1>, vector<2x128xf32>
    %c0_41 = arith.constant 0 : index
    %c0_42 = arith.constant 0 : index
    %75 = vector.load %arg8[%c0_41, %c0_42] : memref<128x128xf32, #tpu.memory_space<vmem>>, vector<128x128xf32>
    %cst_43 = arith.constant dense<0.000000e+00> : vector<2x128xf32>
    %76 = tpu.matmul %74, %75, %cst_43 {dimension_numbers = #tpu.dot_dimension_numbers<[1], [0], [0], [1], [0, 0, 1, 1], [], []>} : vector<2x128xf32>, vector<128x128xf32>, vector<2x128xf32> -> vector<2x128xf32>
    %77 = vector.extract_strided_slice %76 {offsets = [0, 0], sizes = [1, 128], strides = [1, 1]} : vector<2x128xf32> to vector<1x128xf32>
    %cst_44 = arith.constant 0.001953125 : f32
    %78 = vector.broadcast %cst_44 : f32 to vector<1x128xf32>
    %79 = arith.mulf %77, %78 : vector<1x128xf32>
    %80 = vector.extract_strided_slice %76 {offsets = [1, 0], sizes = [1, 128], strides = [1, 1]} : vector<2x128xf32> to vector<1x128xf32>
    %cst_45 = arith.constant 0.001953125 : f32
    %81 = vector.broadcast %cst_45 : f32 to vector<1x128xf32>
    %82 = arith.mulf %80, %81 : vector<1x128xf32>
    %83 = arith.mulf %79, %79 : vector<1x128xf32>
    %84 = arith.subf %82, %83 : vector<1x128xf32>
    %cst_46 = arith.constant 0.000000e+00 : f32
    %85 = vector.broadcast %cst_46 : f32 to vector<1x128xf32>
    %86 = arith.maximumf %84, %85 : vector<1x128xf32>
    %c0_47 = arith.constant 0 : index
    %c0_48 = arith.constant 0 : index
    %87 = vector.load %arg9[%c0_47, %c0_48] : memref<1x128xf32, #tpu.memory_space<vmem>>, vector<1x128xf32>
    %cst_49 = arith.constant 9.99999974E-6 : f32
    %88 = vector.broadcast %cst_49 : f32 to vector<1x128xf32>
    %89 = arith.addf %86, %88 : vector<1x128xf32>
    %90 = math.rsqrt %89 : vector<1x128xf32>
    %91 = arith.mulf %87, %90 : vector<1x128xf32>
    %c0_50 = arith.constant 0 : index
    %c0_51 = arith.constant 0 : index
    %92 = vector.load %arg10[%c0_50, %c0_51] : memref<1x128xf32, #tpu.memory_space<vmem>>, vector<1x128xf32>
    %93 = arith.mulf %79, %91 : vector<1x128xf32>
    %94 = arith.subf %92, %93 : vector<1x128xf32>
    %95 = vector.broadcast %91 : vector<1x128xf32> to vector<32x128xf32>
    %96 = arith.mulf %61, %95 : vector<32x128xf32>
    %97 = vector.broadcast %94 : vector<1x128xf32> to vector<32x128xf32>
    %98 = arith.addf %96, %97 : vector<32x128xf32>
    %99 = math.tanh %98 : vector<32x128xf32>
    %c0_52 = arith.constant 0 : index
    %c0_53 = arith.constant 0 : index
    %100 = vector.load %arg11[%c0_52, %c0_53] : memref<32x128xf32, #tpu.memory_space<vmem>>, vector<32x128xf32>
    tpu.vector_store %arg11[%c0_52, %c0_53], %99 {strides = array<i32>} : memref<32x128xf32, #tpu.memory_space<vmem>>, vector<32x128xf32>,
    return
  }
}

</mosaic_0001>

<bundles_post_ra>
// kernel: encoder_client_forward.1
= control target key start
LH: loop header
LB: loop body
LE: loop exit
PB: predicated region body
PF: predicated region fallthrough
CT: control target
= control target key end

     0   :  { %vm58_vm0 = vcmask 261120   ;;  %vm164_vm1 = vcmask 523264   ;;  %v2005_v61 = vmov 0.0|0.0   ;;  %vm2006_vm2 = vmmov 0   ;;  %s2519_s0 = inlined_call_operand.vmem [shape: f32[32,64], index: 0, kind: input, shape index: {}]   ;;  %s2520_s1 = inlined_call_operand.vmem [shape: f32[32,32], index: 1, kind: input, shape index: {}]   ;;  %s2521_s3 = inlined_call_operand.vmem [shape: f32[192,64], index: 3, kind: input, shape index: {}]   ;;  %s2522_s2 = inlined_call_operand.vmem [shape: f32[32,32], index: 2, kind: input, shape index: {}]   ;;  %s2523_s4 = inlined_call_operand.vmem [shape: f32[64,64], index: 4, kind: input, shape index: {}]   ;;  %s2524_s5 = inlined_call_operand.vmem [shape: f32[1,64], index: 5, kind: input, shape index: {}]   ;;  %s2525_s6 = inlined_call_operand.vmem [shape: f32[1,64], index: 6, kind: input, shape index: {}]   ;;  %s2526_s7 = inlined_call_operand.vmem [shape: f32[192,128], index: 7, kind: input, shape index: {}]   ;;  %s2527_s8 = inlined_call_operand.vmem [shape: f32[128,128], index: 8, kind: input, shape index: {}]   ;;  %s2528_s9 = inlined_call_operand.vmem [shape: f32[1,128], index: 9, kind: input, shape index: {}]   ;;  %s2529_s10 = inlined_call_operand.vmem [shape: f32[1,128], index: 10, kind: input, shape index: {}]   ;;  %s2530_s11 = inlined_call_operand.vmem [shape: f32[32,128], index: 11, kind: output, shape index: {}]  }
   0x1   :  { %v2072_v0 = vld [vmem:[%s2519_s0] sm:$0xff]  ;;  %v2077_v1 = vld [vmem:[%s2519_s0 + $0x8] sm:$0xff]  ;;  %v2082_v2 = vld [vmem:[%s2519_s0 + $0x10] sm:$0xff] }
   0x2   :  { %v1809_v3 = vpack.c.bf16 %v2077_v1, %v2072_v0  ;;  %v2089_v4 = vld [vmem:[%s2519_s0 + $0x18] sm:$0xff]  ;;  %v2094_v5 = vld [vmem:[%s2520_s1] sm:$0xff]  ;;  %v157_v8 = vld [vmem:[%s2521_s3 + $0x8] sm:$0xff] }
   0x3   :  { %v1813_v6 = vpack.c.bf16 %v2089_v4, %v2082_v2  ;;  %1575 = vmatprep.mubr.msk.f32.mxu0 %vm58_vm0, %v2094_v5  ;;  %v156_v7 = vld [vmem:[%s2521_s3] sm:$0xff]  ;;  %v158_v9 = vld [vmem:[%s2521_s3 + $0x10] sm:$0xff]  ;;  %v159_v11 = vld [vmem:[%s2521_s3 + $0x18] sm:$0xff] }
   0x4   :  { %1810 = vmatprep.subr.bf16.mxu0 %v1809_v3  ;;  %v1817_v10 = vpack.c.bf16 %v157_v8, %v156_v7  ;;  %v1821_v12 = vpack.c.bf16 %v159_v11, %v158_v9  ;;  %v160_v13 = vld [vmem:[%s2521_s3 + $0x20] sm:$0xff]  ;;  %v161_v14 = vld [vmem:[%s2521_s3 + $0x28] sm:$0xff]  ;;  %v2126_v16 = vld [vmem:[%s2520_s1 + $0x10] sm:$0xff]  ;;  %v2007_v8 = vmov 0.0  }
   0x5   :  { %1812 = vmatpush3.bf16.msra.mxu0 %v1809_v3  ;;  %v2121_v15 = vld [vmem:[%s2520_s1 + $0x8] sm:$0xff]  ;;  %v1825_v17 = vpack.c.bf16 %v161_v14, %v160_v13  ;;  %v162_v18 = vld [vmem:[%s2521_s3 + $0x30] sm:$0xff]  ;;  %v163_v19 = vld [vmem:[%s2521_s3 + $0x38] sm:$0xff] }
   0x6   :  { %1814 = vmatprep.subr.bf16.mxu0 %v1813_v6  ;;  %1818 = vmatprep.subr.bf16.mxu1 %v1817_v10  ;;  %v2141_v20 = vld [vmem:[%s2520_s1 + $0x18] sm:$0xff]  ;;  %v2146_v21 = vld [vmem:[%s2522_s2] sm:$0xff]  ;;  %v1829_v22 = vpack.c.bf16 %v163_v19, %v162_v18  ;;  %v2155_v23 = vld [vmem:[%s2522_s2 + $0x8] sm:$0xff] }
   0x7   :  { %1820 = vmatpush3.bf16.msra.mxu1 %v1817_v10  ;;  %v2160_v24 = vld [vmem:[%s2522_s2 + $0x10] sm:$0xff]  ;;  %v2169_v25 = vld [vmem:[%s2522_s2 + $0x18] sm:$0xff]  ;;  %v50_v26 = vld [vmem:[%s2521_s3 + $0x40] sm:$0xff] }
   0x8   :  { %1822 = vmatprep.subr.bf16.mxu1 %v1821_v12  ;;  %v51_v27 = vld [vmem:[%s2521_s3 + $0x48] sm:$0xff]  ;;  %v52_v29 = vld [vmem:[%s2521_s3 + $0x50] sm:$0xff]  ;;  %v53_v30 = vld [vmem:[%s2521_s3 + $0x58] sm:$0xff] }
   0x9   :  { %1816 = vmatpush3.bf16.msra.mxu0 %v1813_v6  ;;  %v1833_v28 = vpack.c.bf16 %v51_v27, %v50_v26  ;;  %v1837_v33 = vpack.c.bf16 %v53_v30, %v52_v29  ;;  %v54_v34 = vld [vmem:[%s2521_s3 + $0x60] sm:$0xff]  ;;  %v55_v35 = vld [vmem:[%s2521_s3 + $0x68] sm:$0xff]  ;;  %v56_v39 = vld [vmem:[%s2521_s3 + $0x70] sm:$0xff] }
   0xa   :  { %1850 = vmatprep.subr.bf16.mxu0 %v1809_v3  ;;  %v1841_v37 = vpack.c.bf16 %v55_v35, %v54_v34  ;;  %v57_v40 = vld [vmem:[%s2521_s3 + $0x78] sm:$0xff]  ;;  %v456_v44 = vld [vmem:[%s2521_s3 + $0x80] sm:$0xff]  ;;  %v457_v45 = vld [vmem:[%s2521_s3 + $0x88] sm:$0xff] }
   0xb   :  { %1824 = vmatpush3.bf16.msra.mxu1 %v1821_v12  ;;  %v1845_v42 = vpack.c.bf16 %v57_v40, %v56_v39  ;;  %v1857_v47 = vpack.c.bf16 %v457_v45, %v456_v44  ;;  %v458_v49 = vld [vmem:[%s2521_s3 + $0x90] sm:$0xff]  ;;  %v459_v50 = vld [vmem:[%s2521_s3 + $0x98] sm:$0xff]  ;;  %v460_v52 = vld [vmem:[%s2521_s3 + $0xa0] sm:$0xff]  ;;  %v595_v40 = vlaneseq }
   0xc   :  { %1576 = vmatmul.mubr.msk.f32.vlgmr.msra.gmra.mrb[0].mxu0 %vm58_vm0, %v2121_v15  ;;  %1826 = vmatprep.subr.bf16.mxu1 %v1825_v17  ;;  %v1861_v51 = vpack.c.bf16 %v459_v50, %v458_v49  ;;  %v461_v53 = vld [vmem:[%s2521_s3 + $0xa8] sm:$0xff]  ;;  %v462_v55 = vld [vmem:[%s2521_s3 + $0xb0] sm:$0xff]  ;;  %v463_v56 = vld [vmem:[%s2521_s3 + $0xb8] sm:$0xff] }
   0xd   :  { %1578 = vmatprep.mubr.msk.f32.mxu0 %vm58_vm0, %v2126_v16  ;;  %1852 = vmatpush3.bf16.msra.mxu0 %v1809_v3  ;;  %v1865_v54 = vpack.c.bf16 %v461_v53, %v460_v52  ;;  %v1869_v57 = vpack.c.bf16 %v463_v56, %v462_v55  ;;  %v599_v58 = vld [vmem:[%s2523_s4] sm:$0xff]  ;;  %v600_v59 = vld [vmem:[%s2523_s4 + $0x8] sm:$0xff]  ;;  %v601_v62 = vld [vmem:[%s2523_s4 + $0x10] sm:$0xff]  ;;  %v2287_v45 = vshrl.u32 %v595_v40, 7 }
   0xe   :  { %1854 = vmatprep.subr.bf16.mxu0 %v1813_v6  ;;  %v1874_v60 = vpack.c.bf16 %v600_v59, %v599_v58  ;;  %v602_v63 = vld [vmem:[%s2523_s4 + $0x18] sm:$0xff]  ;;  %v832_v40 = vld [vmem:[%s2526_s7 + $0x20] sm:$0xff] }
   0xf   :  { %1828 = vmatpush3.bf16.msra.mxu1 %v1825_v17  ;;  %vm597_vm3 = vcmp.eq.s32.totalorder %v2287_v45, 0 }
  0x10   :  { %1579 = vmatmul.mubr.msk.f32.gmra.mrb[2].mxu0 %vm58_vm0, %v2141_v20  ;;  %1830 = vmatprep.subr.bf16.mxu1 %v1829_v22 }
  0x11   :  { %1856 = vmatpush3.bf16.msra.mxu0 %v1813_v6  ;;  %1633 = vmatprep.mubr.msk.f32.mxu0 %vm58_vm0, %v2146_v21  ;;  %v606_v6 = vld [vmem:[%s2523_s4 + $0x38] sm:$0xff] }
  0x12   :  { %1873 = vmatprep.subr.bf16.mxu0 %v2005_v61 }
  0x13   :  { %1832 = vmatpush3.bf16.msra.mxu1 %v1829_v22 }
  0x14   :  { %1634 = vmatmul.mubr.msk.f32.vlgmr.msra.gmra.mrb[4].mxu0 %vm58_vm0, %v2155_v23  ;;  %1834 = vmatprep.subr.bf16.mxu1 %v1833_v28 }
  0x15   :  { %1636 = vmatprep.mubr.msk.f32.mxu0 %vm58_vm0, %v2160_v24  ;;  %1875 = vmatpush3.bf16.msra.mxu0 %v1874_v60  ;;  %v2008_v60 = vmov 1966171168  }
  0x16   :  { %1876 = vmatprep.subr.bf16.mxu0 %v2005_v61 }
  0x18   :  { %1637 = vmatmul.mubr.msk.f32.gmra.mrb[6].mxu0 %vm58_vm0, %v2169_v25 }
  0x19   :  { %1677 = vmatprep.mubr.msk.f32.mxu0 %vm2006_vm2, %v2007_v8 }
  0xdf   :  { %v1577_v31 = vpop.f32.mrb[0].mxu0 }
  0xe0   :  { %v137_v32 = vpop.f32.mrb[1].mxu0 }
  0xe1   :  { %1597 = vmatprep.mubr.msk.f32.mxu1 %vm164_vm1, %v137_v32 }
  0xe2   :  { %1598 = vmatmul.mubr.msk.f32.vlgmr.msra.gmra.mrb[0].mxu1 %vm164_vm1, %v1577_v31 }
  0xe3   :  { %1836 = vmatpush3.bf16.msra.mxu1 %v1833_v28  ;;  %v1580_v36 = vpop.f32.mrb[2].mxu0 }
  0xe4   :  { %1838 = vmatprep.subr.bf16.mxu1 %v1837_v33  ;;  %v147_v38 = vpop.f32.mrb[3].mxu0 }
  0xe5   :  { %1600 = vmatprep.mubr.msk.f32.mxu1 %vm164_vm1, %v147_v38 }
  0xe6   :  { %1601 = vmatmul.mubr.msk.f32.gmra.mrb[2].mxu1 %vm164_vm1, %v1580_v36 }
  0xe7   :  { %1840 = vmatpush3.bf16.msra.mxu1 %v1837_v33  ;;  %1619 = vmatprep.mubr.msk.f32.mxu1 %vm164_vm1, %v2072_v0  ;;  %v1635_v41 = vpop.f32.mrb[4].mxu0  ;;  %v1877_v0 = vpack.c.bf16 %v602_v63, %v601_v62  ;;  %v692_v62 = vunpack.c.l.s4 %v2008_v60 }
  0xe8   :  { %1842 = vmatprep.subr.bf16.mxu1 %v1841_v37  ;;  %v437_v43 = vpop.f32.mrb[5].mxu0 }
  0xe9   :  { %1878 = vmatpush3.bf16.msra.mxu0 %v1877_v0  ;;  %v693_v63 = vunpack.c.0.s8 %v692_v62 }
  0xea   :  { %1879 = vmatprep.subr.bf16.mxu0 %v2005_v61 }
  0xeb   :  { %1844 = vmatpush3.bf16.msra.mxu1 %v1841_v37  ;;  %v1638_v46 = vpop.f32.mrb[6].mxu0  ;;  %v2296_v0 = vsub.s32 %v693_v63, %v2287_v45 }
  0xec   :  { %1846 = vmatprep.subr.bf16.mxu1 %v1845_v42  ;;  %v447_v48 = vpop.f32.mrb[7].mxu0 }
  0xef   :  { %1848 = vmatpush3.bf16.msra.mxu1 %v1845_v42 }
  0xf0   :  { %1858 = vmatprep.subr.bf16.mxu1 %v1857_v47 }
  0xf2   :  { %1620 = vmatmul.mubr.msk.f32.vlgmr.msra.gmra.mrb[0].mxu1 %vm164_vm1, %v2077_v1  ;;  %v603_v1 = vld [vmem:[%s2523_s4 + $0x20] sm:$0xff] }
  0xf3   :  { %1860 = vmatpush3.bf16.msra.mxu1 %v1857_v47  ;;  %1622 = vmatprep.mubr.msk.f32.mxu1 %vm164_vm1, %v2082_v2  ;;  %v604_v2 = vld [vmem:[%s2523_s4 + $0x28] sm:$0xff] }
  0xf4   :  { %1862 = vmatprep.subr.bf16.mxu1 %v1861_v51  ;;  %v1880_v3 = vpack.c.bf16 %v604_v2, %v603_v1 }
  0xf6   :  { %1623 = vmatmul.mubr.msk.f32.gmra.mrb[2].mxu1 %vm164_vm1, %v2089_v4  ;;  %1881 = vmatpush3.bf16.msra.mxu0 %v1880_v3  ;;  %v605_v4 = vld [vmem:[%s2523_s4 + $0x30] sm:$0xff] }
  0xf7   :  { %1864 = vmatpush3.bf16.msra.mxu1 %v1861_v51  ;;  %1655 = vmatprep.mubr.msk.f32.mxu1 %vm164_vm1, %v437_v43  ;;  %v1883_v7 = vpack.c.bf16 %v606_v6, %v605_v4  ;;  %v2304_v6 = vsub.s32 0, %v2287_v45 }
  0xf8   :  { %1866 = vmatprep.subr.bf16.mxu1 %v1865_v54  ;;  %1882 = vmatprep.subr.bf16.mxu0 %v2005_v61 }
  0xfa   :  { %1884 = vmatpush3.bf16.msra.mxu0 %v1883_v7 }
  0xfb   :  { %1868 = vmatpush3.bf16.msra.mxu1 %v1865_v54 }
  0xfc   :  { %1870 = vmatprep.subr.bf16.mxu1 %v1869_v57 }
  0xff   :  { %1872 = vmatpush3.bf16.msra.mxu1 %v1869_v57 }
 0x102   :  { %1656 = vmatmul.mubr.msk.f32.vlgmr.msra.gmra.mrb[0].mxu1 %vm164_vm1, %v1635_v41 }
 0x103   :  { %1658 = vmatprep.mubr.msk.f32.mxu1 %vm164_vm1, %v447_v48 }
 0x106   :  { %1659 = vmatmul.mubr.msk.f32.gmra.mrb[2].mxu1 %vm164_vm1, %v1638_v46 }
 0x107   :  { %1746 = vmatprep.mubr.msk.f32.mxu1 %vm58_vm0, %v2146_v21 }
 0x1d5   :  { %v2269_v9 = vpop.f32.mrb[0].mxu1 }
 0x1d6   :  { %v566_v10 = vsel %vm164_vm1, %v2269_v9, 0.0  ;;  %v579_v11 = vmul.f32 %v2269_v9, %v2269_v9  ;;  %v2275_v12 = vpop.f32.mrb[1].mxu1 }
 0x1d7   :  { %v565_v13 = vsel %vm164_vm1, %v2275_v12, 0.0  ;;  %v578_v14 = vmul.f32 %v2275_v12, %v2275_v12 }
 0x1d8   :  { %v583_v17 = vsel %vm164_vm1, %v579_v11, 0.0  ;;  %v567_v18 = vadd.f32 %v566_v10, %v565_v13  ;;  %v708_v10 = vld [vmem:[%s2525_s6] sm:$0x1] }
 0x1d9   :  { %v582_v19 = vsel %vm164_vm1, %v578_v14, 0.0  ;;  %v1660_v21 = vpop.f32.mrb[2].mxu1 }
 0x1da   :  { %v584_v22 = vadd.f32 %v583_v17, %v582_v19  ;;  %v552_v26 = vpop.f32.mrb[3].mxu1  ;;  %v581_v27 = vmul.f32 %v1660_v21, %v1660_v21  ;;  %v570_v31 = vsel %vm164_vm1, %v1660_v21, 0.0 }
 0x1db   :  { %v568_v28 = vsel %vm164_vm1, %v552_v26, 0.0  ;;  %v580_v29 = vmul.f32 %v552_v26, %v552_v26 }
 0x1dc   :  { %v569_v30 = vadd.f32 %v568_v28, %v567_v18  ;;  %v587_v35 = vsel %vm164_vm1, %v581_v27, 0.0 }
 0x1dd   :  { %v585_v32 = vsel %vm164_vm1, %v580_v29, 0.0 }
 0x1de   :  { %v571_v33 = vadd.f32 %v570_v31, %v569_v30  ;;  %v586_v34 = vadd.f32 %v585_v32, %v584_v22 }
 0x1e0   :  { %v572_v36 = vrot.slane %v571_v33, 4  ;;  %v588_v37 = vadd.f32 %v587_v35, %v586_v34  ;;  %v829_v34 = vld [vmem:[%s2526_s7 + $0x8] sm:$0xff] }
 0x1e2   :  { %v573_v38 = vadd.f32 %v572_v36, %v571_v33  ;;  %v589_v39 = vrot.slane %v588_v37, 4 }
 0x1e4   :  { %v574_v41 = vrot.slane %v573_v38, 2  ;;  %v590_v42 = vadd.f32 %v589_v39, %v588_v37  ;;  %v830_v37 = vld [vmem:[%s2526_s7 + $0x10] sm:$0xff] }
 0x1e6   :  { %v575_v43 = vadd.f32 %v574_v41, %v573_v38  ;;  %v591_v44 = vrot.slane %v590_v42, 2  ;;  %v831_v38 = vld [vmem:[%s2526_s7 + $0x18] sm:$0xff]  ;;  %v833_v41 = vld [vmem:[%s2526_s7 + $0x28] sm:$0xff] }
 0x1e7   :  { %v1897_v39 = vpack.c.bf16 %v831_v38, %v830_v37  ;;  %v1260_v37 = vld [vmem:[%s2527_s8 + $0x68] sm:$0xff] }
 0x1e8   :  { %v576_v46 = vrot.slane %v575_v43, 1  ;;  %v592_v47 = vadd.f32 %v591_v44, %v590_v42  ;;  %v1249_v44 = vld [vmem:[%s2527_s8 + $0x10] sm:$0xff] }
 0x1ea   :  { %v593_v48 = vrot.slane %v592_v47, 1  ;;  %v577_v49 = vadd.f32 %v576_v46, %v575_v43  ;;  %v1248_v43 = vld [vmem:[%s2527_s8 + $0x8] sm:$0xff] }
 0x1ec   :  { %v594_v50 = vadd.f32 %v593_v48, %v592_v47  ;;  %v1250_v47 = vld [vmem:[%s2527_s8 + $0x18] sm:$0xff] }
 0x1ed   :  { %v1953_v48 = vpack.c.bf16 %v1250_v47, %v1249_v44 }
 0x1ee   :  { %v598_v51 = vsel %vm597_vm3, %v577_v49, %v594_v50  ;;  %v737_v49 = vld [vmem:[%s2526_s7 + $0x50] sm:$0xff]  ;;  %v738_v50 = vld [vmem:[%s2526_s7 + $0x58] sm:$0xff] }
 0x1ef   :  { %1678 = vmatmul.mubr.msk.f32.vlgmr.msra.gmra.mrb[8].mxu0 %vm164_vm1, %v598_v51 }
 0x1f0   :  { %1688 = vmatprep.mubr.msk.f32.mxu0 %vm58_vm0, %v2094_v5  ;;  %v687_v5 = vld [vmem:[%s2524_s5] sm:$0x1] }
 0x2c2   :  { %v676_v52 = vpop.f32.mrb[8].mxu0 }
 0x2c3   :  { %v680_v53 = vmul.f32 0.001953125, %v676_v52  ;;  %v1679_v54 = vpop.f32.mrb[9].mxu0 }
 0x2c4   :  { %v1913_v54 = vpack.c.bf16 %v738_v50, %v737_v49 }
 0x2c5   :  { %v681_v55 = vmul.f32 %v680_v53, %v680_v53 }
 0x2c7   :  { %v683_v56 = vrot.slane %v681_v55, 7 }
 0x2c9   :  { %v685_v57 = vsub.f32 %v680_v53, %v683_v56  ;;  %v739_v56 = vld [vmem:[%s2526_s7 + $0x60] sm:$0xff] }
 0x2cb   :  { %v686_v58 = vmax.f32 %v685_v57, 0.0  ;;  %v740_v57 = vld [vmem:[%s2526_s7 + $0x68] sm:$0xff] }
 0x2cc   :  { %v1917_v62 = vpack.c.bf16 %v740_v57, %v739_v56 }
 0x2cd   :  { %v688_v59 = vadd.f32 1e-05, %v686_v58 }
 0x2cf   :  { %1993 = vrsqrt.f32 %v688_v59 }
 0x2d9   :  { %v1994_v1 = vpop.eup %1993 }
 0x2da   :  { %v697_v2 = vrot.slane %v1994_v1, %v2296_v0  ;;  %v741_v1 = vld [vmem:[%s2526_s7 + $0x70] sm:$0xff] }
 0x2dc   :  { %v698_v3 = vcombine.high %v697_v2, %v697_v2  ;;  %v742_v2 = vld [vmem:[%s2526_s7 + $0x78] sm:$0xff] }
 0x2de   :  { %v705_v4 = vrot.slane %v698_v3, %v2296_v0  ;;  %v1921_v3 = vpack.c.bf16 %v742_v2, %v741_v1 }
 0x2e0   :  { %v707_v7 = vmul.f32 %v705_v4, %v687_v5  ;;  %v1115_v5 = vld [vmem:[%s2526_s7 + $0x80] sm:$0xff]  ;;  %v1116_v4 = vld [vmem:[%s2526_s7 + $0x88] sm:$0xff] }
 0x2e2   :  { %v709_v11 = vmul.f32 %v707_v7, %v680_v53  ;;  %v715_v13 = vrot.slane %v707_v7, %v2304_v6  ;;  %v1933_v7 = vpack.c.bf16 %v1116_v4, %v1115_v5 }
 0x2e4   :  { %v710_v14 = vsub.f32 %v708_v10, %v709_v11  ;;  %v717_v17 = vmul.f32 %v715_v13, %v2275_v12  ;;  %v718_v18 = vmul.f32 %v2269_v9, %v715_v13  ;;  %v719_v19 = vmul.f32 %v715_v13, %v552_v26  ;;  %v828_v26 = vld [vmem:[%s2526_s7] sm:$0xff]  ;;  %v1117_v10 = vld [vmem:[%s2526_s7 + $0x90] sm:$0xff]  ;;  %v1118_v11 = vld [vmem:[%s2526_s7 + $0x98] sm:$0xff] }
 0x2e5   :  { %v720_v22 = vmul.f32 %v1660_v21, %v715_v13  ;;  %v1893_v36 = vpack.c.bf16 %v829_v34, %v828_v26  ;;  %v1937_v13 = vpack.c.bf16 %v1118_v11, %v1117_v10  ;;  %v1257_v26 = vld [vmem:[%s2527_s8 + $0x50] sm:$0xff]  ;;  %v1258_v34 = vld [vmem:[%s2527_s8 + $0x58] sm:$0xff] }
 0x2e6   :  { %v725_v27 = vrot.slane %v710_v14, %v2304_v6  ;;  %v1119_v14 = vld [vmem:[%s2526_s7 + $0xa0] sm:$0xff] }
 0x2e8   :  { %v2313_v28 = vadd.f32 %v725_v27, %v717_v17  ;;  %v2315_v29 = vadd.f32 %v725_v27, %v718_v18  ;;  %v2317_v30 = vadd.f32 %v725_v27, %v719_v19  ;;  %v2319_v31 = vadd.f32 %v725_v27, %v720_v22  ;;  %v1120_v17 = vld [vmem:[%s2526_s7 + $0xa8] sm:$0xff]  ;;  %v1121_v19 = vld [vmem:[%s2526_s7 + $0xb0] sm:$0xff]  ;;  %v1122_v22 = vld [vmem:[%s2526_s7 + $0xb8] sm:$0xff] }
 0x2e9   :  { %v1941_v18 = vpack.c.bf16 %v1120_v17, %v1119_v14  ;;  %v1945_v27 = vpack.c.bf16 %v1122_v22, %v1121_v19  ;;  %v1340_v17 = vld [vmem:[%s2528_s9] sm:$0x1] }
 0x2ea   :  { %v731_v32 = vmax.f32 %v2313_v28, 0.0  ;;  %v732_v33 = vmax.f32 %v2315_v29, 0.0  ;;  %v733_v12 = vmax.f32 %v2317_v30, 0.0  ;;  %v734_v9 = vmax.f32 %v2319_v31, 0.0  ;;  %v1251_v28 = vld [vmem:[%s2527_s8 + $0x20] sm:$0xff]  ;;  %v1252_v29 = vld [vmem:[%s2527_s8 + $0x28] sm:$0xff] }
 0x2eb   :  { %v1956_v30 = vpack.c.bf16 %v1252_v29, %v1251_v28  ;;  %v1253_v31 = vld [vmem:[%s2527_s8 + $0x30] sm:$0xff]  ;;  %v1361_v19 = vld [vmem:[%s2529_s10] sm:$0x1] }
 0x2ec   :  { %v1885_v21 = vpack.c.bf16 %v732_v33, %v731_v32  ;;  %v1889_v35 = vpack.c.bf16 %v734_v9, %v733_v12 }
 0x2ee   :  { %1886 = vmatprep.subr.bf16.mxu0 %v1885_v21  ;;  %1926 = vmatprep.subr.bf16.mxu1 %v1885_v21 }
 0x2ef   :  { %1888 = vmatpush3.bf16.msra.mxu0 %v1885_v21  ;;  %1928 = vmatpush3.bf16.msra.mxu1 %v1885_v21 }
 0x2f0   :  { %1890 = vmatprep.subr.bf16.mxu0 %v1889_v35  ;;  %1930 = vmatprep.subr.bf16.mxu1 %v1889_v35 }
 0x2f3   :  { %1892 = vmatpush3.bf16.msra.mxu0 %v1889_v35  ;;  %1932 = vmatpush3.bf16.msra.mxu1 %v1889_v35  ;;  %v1965_v35 = vpack.c.bf16 %v1258_v34, %v1257_v26 }
 0x2f4   :  { %1894 = vmatprep.subr.bf16.mxu0 %v1893_v36  ;;  %1949 = vmatprep.subr.bf16.mxu1 %v2005_v61 }
 0x2f6   :  { %1689 = vmatmul.mubr.msk.f32.vlgmr.msra.gmra.mrb[10].mxu0 %vm58_vm0, %v2121_v15  ;;  %1747 = vmatmul.mubr.msk.f32.vlgmr.msra.gmra.mrb[4].mxu1 %vm58_vm0, %v2155_v23  ;;  %v1901_v15 = vpack.c.bf16 %v833_v41, %v832_v40  ;;  %v834_v23 = vld [vmem:[%s2526_s7 + $0x30] sm:$0xff]  ;;  %v1262_v40 = vld [vmem:[%s2527_s8 + $0x78] sm:$0xff] }
 0x2f7   :  { %1691 = vmatprep.mubr.msk.f32.mxu0 %vm58_vm0, %v2126_v16  ;;  %1749 = vmatprep.mubr.msk.f32.mxu1 %vm58_vm0, %v2160_v24  ;;  %v835_v16 = vld [vmem:[%s2526_s7 + $0x38] sm:$0xff] }
 0x2f8   :  { %1896 = vmatpush3.bf16.msra.mxu0 %v1893_v36  ;;  %v1905_v24 = vpack.c.bf16 %v835_v16, %v834_v23  ;;  %v1259_v36 = vld [vmem:[%s2527_s8 + $0x60] sm:$0xff] }
 0x2f9   :  { %1898 = vmatprep.subr.bf16.mxu0 %v1897_v39  ;;  %v1968_v38 = vpack.c.bf16 %v1260_v37, %v1259_v36 }
 0x2fa   :  { %1692 = vmatmul.mubr.msk.f32.gmra.mrb[12].mxu0 %vm58_vm0, %v2141_v20  ;;  %1750 = vmatmul.mubr.msk.f32.gmra.mrb[6].mxu1 %vm58_vm0, %v2169_v25  ;;  %v735_v20 = vld [vmem:[%s2526_s7 + $0x40] sm:$0xff]  ;;  %v736_v25 = vld [vmem:[%s2526_s7 + $0x48] sm:$0xff] }
 0x2fb   :  { %1806 = vmatprep.mubr.msk.f32.mxu1 %vm2006_vm2, %v2007_v8  ;;  %v1909_v42 = vpack.c.bf16 %v736_v25, %v735_v20  ;;  %v1247_v8 = vld [vmem:[%s2527_s8] sm:$0xff] }
 0x2fc   :  { %1900 = vmatpush3.bf16.msra.mxu0 %v1897_v39  ;;  %v1950_v46 = vpack.c.bf16 %v1248_v43, %v1247_v8  ;;  %v1261_v39 = vld [vmem:[%s2527_s8 + $0x70] sm:$0xff] }
 0x2fd   :  { %1902 = vmatprep.subr.bf16.mxu0 %v1901_v15  ;;  %v1971_v41 = vpack.c.bf16 %v1262_v40, %v1261_v39 }
 0x2fe   :  { %1951 = vmatpush3.bf16.msra.mxu1 %v1950_v46 }
 0x2ff   :  { %1952 = vmatprep.subr.bf16.mxu1 %v2005_v61 }
 0x300   :  { %1904 = vmatpush3.bf16.msra.mxu0 %v1901_v15 }
 0x301   :  { %1906 = vmatprep.subr.bf16.mxu0 %v1905_v24 }
 0x302   :  { %1954 = vmatpush3.bf16.msra.mxu1 %v1953_v48 }
 0x303   :  { %1955 = vmatprep.subr.bf16.mxu1 %v2005_v61 }
 0x304   :  { %1908 = vmatpush3.bf16.msra.mxu0 %v1905_v24 }
 0x305   :  { %1910 = vmatprep.subr.bf16.mxu0 %v1909_v42 }
 0x306   :  { %1957 = vmatpush3.bf16.msra.mxu1 %v1956_v30 }
 0x307   :  { %1958 = vmatprep.subr.bf16.mxu1 %v2005_v61 }
 0x3c9   :  { %v1690_v51 = vpop.f32.mrb[10].mxu0  ;;  %v1748_v52 = vpop.f32.mrb[4].mxu1 }
 0x3ca   :  { %v809_v53 = vpop.f32.mrb[11].mxu0  ;;  %v1096_v55 = vpop.f32.mrb[5].mxu1 }
 0x3cb   :  { %1710 = vmatprep.mubr.msk.f32.mxu0 %vm164_vm1, %v809_v53 }
 0x3cc   :  { %1711 = vmatmul.mubr.msk.f32.vlgmr.msra.gmra.mrb[14].mxu0 %vm164_vm1, %v1690_v51 }
 0x3cd   :  { %1912 = vmatpush3.bf16.msra.mxu0 %v1909_v42  ;;  %v1693_v58 = vpop.f32.mrb[12].mxu0  ;;  %v1751_v59 = vpop.f32.mrb[6].mxu1 }
 0x3ce   :  { %v819_v60 = vpop.f32.mrb[13].mxu0  ;;  %1914 = vmatprep.subr.bf16.mxu0 %v1913_v54  ;;  %v1106_v63 = vpop.f32.mrb[7].mxu1 }
 0x3cf   :  { %1713 = vmatprep.mubr.msk.f32.mxu0 %vm164_vm1, %v819_v60 }
 0x3d0   :  { %1714 = vmatmul.mubr.msk.f32.gmra.mrb[16].mxu0 %vm164_vm1, %v1693_v58 }
 0x3d1   :  { %1916 = vmatpush3.bf16.msra.mxu0 %v1913_v54  ;;  %1732 = vmatprep.mubr.msk.f32.mxu0 %vm164_vm1, %v731_v32  ;;  %v1254_v32 = vld [vmem:[%s2527_s8 + $0x38] sm:$0xff] }
 0x3d2   :  { %1918 = vmatprep.subr.bf16.mxu0 %v1917_v62 }
 0x3d5   :  { %1920 = vmatpush3.bf16.msra.mxu0 %v1917_v62 }
 0x3d6   :  { %1922 = vmatprep.subr.bf16.mxu0 %v1921_v3 }
 0x3d9   :  { %1924 = vmatpush3.bf16.msra.mxu0 %v1921_v3 }
 0x3da   :  { %1934 = vmatprep.subr.bf16.mxu0 %v1933_v7 }
 0x3dc   :  { %1733 = vmatmul.mubr.msk.f32.vlgmr.msra.gmra.mrb[14].mxu0 %vm164_vm1, %v732_v33  ;;  %v1959_v33 = vpack.c.bf16 %v1254_v32, %v1253_v31 }
 0x3dd   :  { %1735 = vmatprep.mubr.msk.f32.mxu0 %vm164_vm1, %v733_v12  ;;  %1936 = vmatpush3.bf16.msra.mxu0 %v1933_v7  ;;  %v1255_v12 = vld [vmem:[%s2527_s8 + $0x40] sm:$0xff] }
 0x3de   :  { %1938 = vmatprep.subr.bf16.mxu0 %v1937_v13  ;;  %1960 = vmatpush3.bf16.msra.mxu1 %v1959_v33 }
 0x3df   :  { %1961 = vmatprep.subr.bf16.mxu1 %v2005_v61 }
 0x3e0   :  { %1736 = vmatmul.mubr.msk.f32.gmra.mrb[16].mxu0 %vm164_vm1, %v734_v9  ;;  %v1256_v9 = vld [vmem:[%s2527_s8 + $0x48] sm:$0xff] }
 0x3e1   :  { %1940 = vmatpush3.bf16.msra.mxu0 %v1937_v13  ;;  %1768 = vmatprep.mubr.msk.f32.mxu0 %vm164_vm1, %v1096_v55  ;;  %v1962_v21 = vpack.c.bf16 %v1256_v9, %v1255_v12 }
 0x3e2   :  { %1942 = vmatprep.subr.bf16.mxu0 %v1941_v18 }
 0x3e3   :  { %1963 = vmatpush3.bf16.msra.mxu1 %v1962_v21 }
 0x3e4   :  { %1964 = vmatprep.subr.bf16.mxu1 %v2005_v61 }
 0x3e5   :  { %1944 = vmatpush3.bf16.msra.mxu0 %v1941_v18 }
 0x3e6   :  { %1946 = vmatprep.subr.bf16.mxu0 %v1945_v27 }
 0x3e7   :  { %1966 = vmatpush3.bf16.msra.mxu1 %v1965_v35 }
 0x3e8   :  { %1967 = vmatprep.subr.bf16.mxu1 %v2005_v61 }
 0x3e9   :  { %1948 = vmatpush3.bf16.msra.mxu0 %v1945_v27 }
 0x3eb   :  { %1969 = vmatpush3.bf16.msra.mxu1 %v1968_v38 }
 0x3ec   :  { %1769 = vmatmul.mubr.msk.f32.vlgmr.msra.gmra.mrb[14].mxu0 %vm164_vm1, %v1748_v52  ;;  %1970 = vmatprep.subr.bf16.mxu1 %v2005_v61 }
 0x3ed   :  { %1771 = vmatprep.mubr.msk.f32.mxu0 %vm164_vm1, %v1106_v63 }
 0x3ef   :  { %1972 = vmatpush3.bf16.msra.mxu1 %v1971_v41 }
 0x3f0   :  { %1772 = vmatmul.mubr.msk.f32.gmra.mrb[16].mxu0 %vm164_vm1, %v1751_v59 }
 0x4bf   :  { %v1770_v15 = vpop.f32.mrb[14].mxu0 }
 0x4c0   :  { %v1234_v23 = vmul.f32 %v1770_v15, %v1770_v15  ;;  %v1201_v16 = vpop.f32.mrb[15].mxu0 }
 0x4c1   :  { %v1224_v24 = vadd.f32 %v1770_v15, %v1201_v16  ;;  %v1233_v20 = vmul.f32 %v1201_v16, %v1201_v16 }
 0x4c3   :  { %v1237_v25 = vadd.f32 %v1234_v23, %v1233_v20  ;;  %v1773_v42 = vpop.f32.mrb[16].mxu0 }
 0x4c4   :  { %v1211_v8 = vpop.f32.mrb[17].mxu0  ;;  %v1236_v44 = vmul.f32 %v1773_v42, %v1773_v42 }
 0x4c5   :  { %v1225_v43 = vadd.f32 %v1224_v24, %v1211_v8  ;;  %v1235_v61 = vmul.f32 %v1211_v8, %v1211_v8 }
 0x4c7   :  { %v1226_v46 = vadd.f32 %v1773_v42, %v1225_v43  ;;  %v1238_v47 = vadd.f32 %v1237_v25, %v1235_v61 }
 0x4c9   :  { %v1227_v48 = vrot.slane %v1226_v46, 4  ;;  %v1239_v49 = vadd.f32 %v1238_v47, %v1236_v44 }
 0x4cb   :  { %v1228_v50 = vadd.f32 %v1227_v48, %v1226_v46  ;;  %v1240_v51 = vrot.slane %v1239_v49, 4 }
 0x4cd   :  { %v1229_v52 = vrot.slane %v1228_v50, 2  ;;  %v1241_v53 = vadd.f32 %v1240_v51, %v1239_v49 }
 0x4cf   :  { %v1230_v54 = vadd.f32 %v1229_v52, %v1228_v50  ;;  %v1242_v55 = vrot.slane %v1241_v53, 2 }
 0x4d1   :  { %v1231_v56 = vrot.slane %v1230_v54, 1  ;;  %v1243_v57 = vadd.f32 %v1242_v55, %v1241_v53 }
 0x4d3   :  { %v1244_v58 = vrot.slane %v1243_v57, 1  ;;  %v1232_v59 = vadd.f32 %v1231_v56, %v1230_v54 }
 0x4d5   :  { %v1245_v60 = vadd.f32 %v1244_v58, %v1243_v57 }
 0x4d7   :  { %v1246_v62 = vsel %vm597_vm3, %v1232_v59, %v1245_v60 }
 0x4d8   :  { %1807 = vmatmul.mubr.f32.vlgmr.msra.gmra.mrb[8].mxu1 %v1246_v62 }
 0x5ab   :  { %v1329_v63 = vpop.f32.mrb[8].mxu1 }
 0x5ac   :  { %v1333_v1 = vmul.f32 0.001953125, %v1329_v63  ;;  %v1808_v2 = vpop.f32.mrb[9].mxu1 }
 0x5ae   :  { %v1334_v3 = vmul.f32 %v1333_v1, %v1333_v1 }
 0x5b0   :  { %v1336_v5 = vrot.slane %v1334_v3, 7 }
 0x5b2   :  { %v1338_v4 = vsub.f32 %v1333_v1, %v1336_v5 }
 0x5b4   :  { %v1339_v7 = vmax.f32 %v1338_v4, 0.0 }
 0x5b6   :  { %v1341_v10 = vadd.f32 1e-05, %v1339_v7 }
 0x5b8   :  { %1995 = vrsqrt.f32 %v1341_v10 }
 0x5c2   :  { %v1996_v11 = vpop.eup %1995 }
 0x5c3   :  { %v1350_v13 = vrot.slane %v1996_v11, %v2296_v0 }
 0x5c5   :  { %v1351_v14 = vcombine.high %v1350_v13, %v1350_v13 }
 0x5c7   :  { %v1358_v45 = vrot.slane %v1351_v14, %v2296_v0 }
 0x5c9   :  { %v1360_v18 = vmul.f32 %v1358_v45, %v1340_v17 }
 0x5cb   :  { %v1362_v22 = vmul.f32 %v1360_v18, %v1333_v1  ;;  %v1368_v27 = vrot.slane %v1360_v18, %v2304_v6 }
 0x5cd   :  { %v1363_v28 = vsub.f32 %v1361_v19, %v1362_v22  ;;  %v1370_v29 = vmul.f32 %v1368_v27, %v1201_v16  ;;  %v1371_v30 = vmul.f32 %v1770_v15, %v1368_v27  ;;  %v1372_v31 = vmul.f32 %v1368_v27, %v1211_v8 }
 0x5ce   :  { %v1373_v32 = vmul.f32 %v1773_v42, %v1368_v27 }
 0x5cf   :  { %v1378_v33 = vrot.slane %v1363_v28, %v2304_v6 }
 0x5d1   :  { %v1380_v12 = vadd.f32 %v1378_v33, %v1370_v29  ;;  %v1381_v9 = vadd.f32 %v1378_v33, %v1371_v30  ;;  %v1382_v21 = vadd.f32 %v1378_v33, %v1372_v31  ;;  %v1383_v26 = vadd.f32 %v1378_v33, %v1373_v32 }
 0x5d3   :  { %1997 = vtanh.f32 %v1380_v12 }
 0x5d4   :  { %1999 = vtanh.f32 %v1381_v9 }
 0x5d5   :  { %2001 = vtanh.f32 %v1382_v21 }
 0x5d6   :  { %2003 = vtanh.f32 %v1383_v26 }
 0x5dd   :  { %v1998_v0 = vpop.eup %1997 }
 0x5de   :  { %v2000_v34 = vpop.eup %1999  ;;  %1388 = vst [vmem:[%s2530_s11] sm:$0xff] %v1998_v0 }
 0x5df   :  { %v2002_v35 = vpop.eup %2001  ;;  %1389 = vst [vmem:[%s2530_s11 + $0x8] sm:$0xff] %v2000_v34 }
 0x5e0   :  { %v2004_v6 = vpop.eup %2003  ;;  %1390 = vst [vmem:[%s2530_s11 + $0x10] sm:$0xff] %v2002_v35 }
 0x5e1   :  { %1391 = vst [vmem:[%s2530_s11 + $0x18] sm:$0xff] %v2004_v6 }

</bundles_post_ra>
